<compile_context>
chip_gen: v5e
topology: v5e:2x2
jax: 0.10.0
libtpu: 0.0.40
codegen_flags: <defaults>
</compile_context>

<pallas_src>
import jax
import jax.numpy as jnp
from jax.experimental import pallas as pl
from jax.experimental.pallas import tpu as pltpu

# Logical dims of the PyTorch module.
D_IN, D1, D2, D3, D_OUT = 181, 256, 128, 64, 48


def _round_up(n, m):
    return (n + m - 1) // m * m


def _cdiv(a, b):
    return (a + b - 1) // b


def mlp_kernel(x_ref, alpha_ref,
               w1_ref, b1_ref,
               w2_ref, b2_ref,
               w3_ref, b3_ref,
               w4_ref, b4_ref,
               o_ref):
    """Full forward pass of the MLP for one batch tile, entirely in VMEM."""

    def prelu(h, a):
        # PReLU with a single shared parameter (PyTorch default num_parameters=1).
        return jnp.where(h > 0, h, a * h)

    # Scalars from SMEM (sreg path, no vector loads).
    a1 = alpha_ref[0]
    a2 = alpha_ref[1]
    a3 = alpha_ref[2]

    # Layer 1: (T, 181) bf16 x (181, 256) bf16 -> f32 (Mosaic masks the padded K).
    x = x_ref[...].astype(jnp.bfloat16)
    h = jnp.dot(x, w1_ref[...], preferred_element_type=jnp.float32)
    h = prelu(h + b1_ref[...], a1)

    # Layer 2: (T, 256) x (256, 128)
    h = jnp.dot(h.astype(jnp.bfloat16), w2_ref[...],
                preferred_element_type=jnp.float32)
    h = prelu(h + b2_ref[...], a2)

    # Layer 3: (T, 128) x (128, 64)
    h = jnp.dot(h.astype(jnp.bfloat16), w3_ref[...],
                preferred_element_type=jnp.float32)
    h = prelu(h + b3_ref[...], a3)

    # Layer 4: (T, 64) x (64, 48)
    h = jnp.dot(h.astype(jnp.bfloat16), w4_ref[...],
                preferred_element_type=jnp.float32)
    h = h + b4_ref[...]

    # sigmoid(h) = 0.5 * (tanh(h/2) + 1): one EUP transcendental per element
    # (vs. exp + reciprocal), cheap mul/add picked up by the VPU.  f32 so it also
    # runs on v5e's EUP.
    o_ref[...] = (0.5 * (jnp.tanh(0.5 * h) + 1.0)).astype(o_ref.dtype)


def prepare_params(params):
    """Cast weights to bf16, reshape biases to (1, out) f32, pack alphas for SMEM."""
    (w1, b1, a1, w2, b2, a2, w3, b3, a3, w4, b4) = params

    alphas = jnp.stack([a1.reshape(()), a2.reshape(()), a3.reshape(())]
                       ).astype(jnp.float32)                     # (3,) -> SMEM

    bf = lambda w: w.astype(jnp.bfloat16)
    row = lambda b: b.reshape(1, -1).astype(jnp.float32)

    return (alphas,
            bf(w1), row(b1),
            bf(w2), row(b2),
            bf(w3), row(b3),
            bf(w4), row(b4))


def _choose_tile(B, batch_tile):
    """Pick the batch tile: big enough to amortize step overhead, but always >=2
    grid steps when the batch allows it (so v7x's two TensorCores both get work)."""
    tile = min(batch_tile, _round_up(B, 16))
    tile = max(16, _round_up(tile, 16))
    if _cdiv(B, tile) < 2 and B > 16:
        tile = max(16, _round_up(_cdiv(B, 2), 16))
    return tile


def network_forward(x, params, *, batch_tile=2048):
    """x: [B, 181] float32 -> [B, 48] float32.

    batch_tile is the main tuning knob (2048-4096 for large B).  Ragged batches
    are handled by Pallas' masked edge blocks -- no wrapper padding or slicing.
    """
    B, F = x.shape
    assert F == D_IN
    x = x.astype(jnp.float32)

    (alphas, w1, b1, w2, b2, w3, b3, w4, b4) = prepare_params(params)

    tile = _choose_tile(B, batch_tile)
    grid = (_cdiv(B, tile),)

    def rep(arr):
        # Replicated (grid-constant) operand: full-array block, constant index.
        return pl.BlockSpec(arr.shape, lambda i: (0,) * arr.ndim)

    out = pl.pallas_call(
        mlp_kernel,
        out_shape=jax.ShapeDtypeStruct((B, D_OUT), jnp.float32),
        grid_spec=pltpu.PrefetchScalarGridSpec(
            num_scalar_prefetch=0,
            grid=grid,
            in_specs=[
                pl.BlockSpec((tile, D_IN), lambda i: (i, 0)),          # x tile (f32)
                pl.BlockSpec(memory_space=pltpu.MemorySpace.SMEM),     # PReLU alphas
                rep(w1), rep(b1),                                      # layer 1
                rep(w2), rep(b2),                                      # layer 2
                rep(w3), rep(b3),                                      # layer 3
                rep(w4), rep(b4),                                      # layer 4
            ],
            out_specs=pl.BlockSpec((tile, D_OUT), lambda i: (i, 0)),
        ),
        compiler_params=pltpu.CompilerParams(
            dimension_semantics=("parallel",),
            # Covers tile up to ~4096 (x + out double buffers + f32 intermediates
            # + bf16 weights); above v5e's 16 MiB default, below v7x's 64 MiB VMEM.
            vmem_limit_bytes=32 * 1024 * 1024,
        ),
    )(x, alphas, w1, b1, w2, b2, w3, b3, w4, b4)

    return out


def init_params(key):
    """Deterministic synthetic parameters matching the PyTorch module's shapes.

    nn.Linear(in, out): weight [out, in], bias [out] -> stored here as W [in, out],
    b [1, out].  nn.PReLU(): single learnable scalar, init 0.25.
    """
    dims = [(D_IN, D1), (D1, D2), (D2, D3), (D3, D_OUT)]
    layers = []
    for (din, dout) in dims:
        key, kw, kb = jax.random.split(key, 3)
        bound = 1.0 / jnp.sqrt(din)
        w = jax.random.uniform(kw, (din, dout), jnp.float32, -bound, bound)
        b = jax.random.uniform(kb, (1, dout), jnp.float32, -bound, bound)
        layers.append((w, b))
    alpha = jnp.full((1, 1), 0.25, jnp.float32)  # PReLU default init
    (w1, b1), (w2, b2), (w3, b3), (w4, b4) = layers
    return (w1, b1, alpha, w2, b2, alpha, w3, b3, alpha, w4, b4)


def reference_forward(x, params):
    """Pure-JAX (XLA) reference using the same bf16 weight/activation rounding."""
    (w1, b1, a1, w2, b2, a2, w3, b3, a3, w4, b4) = params
    bf = lambda t: t.astype(jnp.bfloat16)
    prelu = lambda h, a: jnp.where(h > 0, h, a.reshape(()) * h)
    h = prelu(jnp.dot(bf(x), bf(w1), preferred_element_type=jnp.float32) + b1, a1)
    h = prelu(jnp.dot(bf(h), bf(w2), preferred_element_type=jnp.float32) + b2, a2)
    h = prelu(jnp.dot(bf(h), bf(w3), preferred_element_type=jnp.float32) + b3, a3)
    h = jnp.dot(bf(h), bf(w4), preferred_element_type=jnp.float32) + b4
    return 1.0 / (1.0 + jnp.exp(-h))


if __name__ == "__main__":
    key = jax.random.PRNGKey(0)
    key, kx = jax.random.split(key)
    B = 200  # deliberately ragged (not a multiple of the tile)
    x = jax.random.normal(kx, (B, D_IN), jnp.float32)
    params = init_params(key)

    # Small tile here to exercise the multi-step grid + masked edge-block paths.
    out = network_forward(x, params, batch_tile=64)
    out = jax.block_until_ready(out)

    ref = reference_forward(x, params)
    assert out.shape == (B, D_OUT)
    max_err = float(jnp.max(jnp.abs(out - ref)))
    assert max_err < 1e-2, f"mismatch vs reference: max abs err {max_err}"
    print("KERNEL_OK")
</pallas_src>

<mosaic_0001>
module attributes {stable_mosaic.version = 11 : i64} {
  func.func @mlp_kernel(%arg0: i32, %arg1: memref<64x181xf32, #tpu.memory_space<vmem>>, %arg2: memref<3xf32, #tpu.memory_space<smem>>, %arg3: memref<181x256xbf16, #tpu.memory_space<vmem>>, %arg4: memref<1x256xf32, #tpu.memory_space<vmem>>, %arg5: memref<256x128xbf16, #tpu.memory_space<vmem>>, %arg6: memref<1x128xf32, #tpu.memory_space<vmem>>, %arg7: memref<128x64xbf16, #tpu.memory_space<vmem>>, %arg8: memref<1x64xf32, #tpu.memory_space<vmem>>, %arg9: memref<64x48xbf16, #tpu.memory_space<vmem>>, %arg10: memref<1x48xf32, #tpu.memory_space<vmem>>, %arg11: memref<64x48xf32, #tpu.memory_space<vmem>>) attributes {dimension_semantics = [#tpu.dimension_semantics<parallel>], iteration_bounds = array<i64: 4>, scalar_prefetch = 0 : i64, scratch_operands = 0 : i64, tpu.core_type = #tpu.core_type<tc>, window_params = [{transform_indices = @transform_0, window_bounds = array<i64: 64, 181>}, {transform_indices = @transform_1, window_bounds = array<i64: 3>}, {pipeline_mode = #tpu.pipeline_mode<synchronous>, transform_indices = @transform_2, window_bounds = array<i64: 181, 256>}, {pipeline_mode = #tpu.pipeline_mode<synchronous>, transform_indices = @transform_3, window_bounds = array<i64: 1, 256>}, {pipeline_mode = #tpu.pipeline_mode<synchronous>, transform_indices = @transform_4, window_bounds = array<i64: 256, 128>}, {pipeline_mode = #tpu.pipeline_mode<synchronous>, transform_indices = @transform_5, window_bounds = array<i64: 1, 128>}, {pipeline_mode = #tpu.pipeline_mode<synchronous>, transform_indices = @transform_6, window_bounds = array<i64: 128, 64>}, {pipeline_mode = #tpu.pipeline_mode<synchronous>, transform_indices = @transform_7, window_bounds = array<i64: 1, 64>}, {pipeline_mode = #tpu.pipeline_mode<synchronous>, transform_indices = @transform_8, window_bounds = array<i64: 64, 48>}, {pipeline_mode = #tpu.pipeline_mode<synchronous>, transform_indices = @transform_9, window_bounds = array<i64: 1, 48>}, {transform_indices = @transform_10, window_bounds = array<i64: 64, 48>}]} {
    %c0 = arith.constant 0 : index
    %0 = memref.load %arg2[%c0] : memref<3xf32, #tpu.memory_space<smem>>
    %c1 = arith.constant 1 : index
    %1 = memref.load %arg2[%c1] : memref<3xf32, #tpu.memory_space<smem>>
    %c2 = arith.constant 2 : index
    %2 = memref.load %arg2[%c2] : memref<3xf32, #tpu.memory_space<smem>>
    %c0_0 = arith.constant 0 : index
    %c0_1 = arith.constant 0 : index
    %3 = vector.load %arg1[%c0_0, %c0_1] : memref<64x181xf32, #tpu.memory_space<vmem>>, vector<64x181xf32>
    %4 = arith.truncf %3 : vector<64x181xf32> to vector<64x181xbf16>
    %c0_2 = arith.constant 0 : index
    %c0_3 = arith.constant 0 : index
    %5 = vector.load %arg3[%c0_2, %c0_3] : memref<181x256xbf16, #tpu.memory_space<vmem>>, vector<181x256xbf16>
    %cst = arith.constant dense<0.000000e+00> : vector<64x256xf32>
    %6 = tpu.matmul %4, %5, %cst {dimension_numbers = #tpu.dot_dimension_numbers<[1], [0], [0], [1], [0, 0, 1, 1], [], []>} : vector<64x181xbf16>, vector<181x256xbf16>, vector<64x256xf32> -> vector<64x256xf32>
    %c0_4 = arith.constant 0 : index
    %c0_5 = arith.constant 0 : index
    %7 = vector.load %arg4[%c0_4, %c0_5] : memref<1x256xf32, #tpu.memory_space<vmem>>, vector<1x256xf32>
    %8 = vector.broadcast %7 : vector<1x256xf32> to vector<64x256xf32>
    %9 = arith.addf %6, %8 : vector<64x256xf32>
    %cst_6 = arith.constant 0.000000e+00 : f32
    %10 = vector.broadcast %cst_6 : f32 to vector<64x256xf32>
    %11 = arith.cmpf ogt, %9, %10 : vector<64x256xf32>
    %12 = vector.broadcast %0 : f32 to vector<64x256xf32>
    %13 = arith.mulf %12, %9 : vector<64x256xf32>
    %14 = arith.select %11, %9, %13 : vector<64x256xi1>, vector<64x256xf32>
    %15 = arith.truncf %14 : vector<64x256xf32> to vector<64x256xbf16>
    %c0_7 = arith.constant 0 : index
    %c0_8 = arith.constant 0 : index
    %16 = vector.load %arg5[%c0_7, %c0_8] : memref<256x128xbf16, #tpu.memory_space<vmem>>, vector<256x128xbf16>
    %cst_9 = arith.constant dense<0.000000e+00> : vector<64x128xf32>
    %17 = tpu.matmul %15, %16, %cst_9 {dimension_numbers = #tpu.dot_dimension_numbers<[1], [0], [0], [1], [0, 0, 1, 1], [], []>} : vector<64x256xbf16>, vector<256x128xbf16>, vector<64x128xf32> -> vector<64x128xf32>
    %c0_10 = arith.constant 0 : index
    %c0_11 = arith.constant 0 : index
    %18 = vector.load %arg6[%c0_10, %c0_11] : memref<1x128xf32, #tpu.memory_space<vmem>>, vector<1x128xf32>
    %19 = vector.broadcast %18 : vector<1x128xf32> to vector<64x128xf32>
    %20 = arith.addf %17, %19 : vector<64x128xf32>
    %cst_12 = arith.constant 0.000000e+00 : f32
    %21 = vector.broadcast %cst_12 : f32 to vector<64x128xf32>
    %22 = arith.cmpf ogt, %20, %21 : vector<64x128xf32>
    %23 = vector.broadcast %1 : f32 to vector<64x128xf32>
    %24 = arith.mulf %23, %20 : vector<64x128xf32>
    %25 = arith.select %22, %20, %24 : vector<64x128xi1>, vector<64x128xf32>
    %26 = arith.truncf %25 : vector<64x128xf32> to vector<64x128xbf16>
    %c0_13 = arith.constant 0 : index
    %c0_14 = arith.constant 0 : index
    %27 = vector.load %arg7[%c0_13, %c0_14] : memref<128x64xbf16, #tpu.memory_space<vmem>>, vector<128x64xbf16>
    %cst_15 = arith.constant dense<0.000000e+00> : vector<64x64xf32>
    %28 = tpu.matmul %26, %27, %cst_15 {dimension_numbers = #tpu.dot_dimension_numbers<[1], [0], [0], [1], [0, 0, 1, 1], [], []>} : vector<64x128xbf16>, vector<128x64xbf16>, vector<64x64xf32> -> vector<64x64xf32>
    %c0_16 = arith.constant 0 : index
    %c0_17 = arith.constant 0 : index
    %29 = vector.load %arg8[%c0_16, %c0_17] : memref<1x64xf32, #tpu.memory_space<vmem>>, vector<1x64xf32>
    %30 = vector.broadcast %29 : vector<1x64xf32> to vector<64x64xf32>
    %31 = arith.addf %28, %30 : vector<64x64xf32>
    %cst_18 = arith.constant 0.000000e+00 : f32
    %32 = vector.broadcast %cst_18 : f32 to vector<64x64xf32>
    %33 = arith.cmpf ogt, %31, %32 : vector<64x64xf32>
    %34 = vector.broadcast %2 : f32 to vector<64x64xf32>
    %35 = arith.mulf %34, %31 : vector<64x64xf32>
    %36 = arith.select %33, %31, %35 : vector<64x64xi1>, vector<64x64xf32>
    %37 = arith.truncf %36 : vector<64x64xf32> to vector<64x64xbf16>
    %c0_19 = arith.constant 0 : index
    %c0_20 = arith.constant 0 : index
    %38 = vector.load %arg9[%c0_19, %c0_20] : memref<64x48xbf16, #tpu.memory_space<vmem>>, vector<64x48xbf16>
    %cst_21 = arith.constant dense<0.000000e+00> : vector<64x48xf32>
    %39 = tpu.matmul %37, %38, %cst_21 {dimension_numbers = #tpu.dot_dimension_numbers<[1], [0], [0], [1], [0, 0, 1, 1], [], []>} : vector<64x64xbf16>, vector<64x48xbf16>, vector<64x48xf32> -> vector<64x48xf32>
    %c0_22 = arith.constant 0 : index
    %c0_23 = arith.constant 0 : index
    %40 = vector.load %arg10[%c0_22, %c0_23] : memref<1x48xf32, #tpu.memory_space<vmem>>, vector<1x48xf32>
    %41 = vector.broadcast %40 : vector<1x48xf32> to vector<64x48xf32>
    %42 = arith.addf %39, %41 : vector<64x48xf32>
    %cst_24 = arith.constant 5.000000e-01 : f32
    %43 = vector.broadcast %cst_24 : f32 to vector<64x48xf32>
    %44 = arith.mulf %43, %42 : vector<64x48xf32>
    %45 = math.tanh %44 : vector<64x48xf32>
    %cst_25 = arith.constant 1.000000e+00 : f32
    %46 = vector.broadcast %cst_25 : f32 to vector<64x48xf32>
    %47 = arith.addf %45, %46 : vector<64x48xf32>
    %cst_26 = arith.constant 5.000000e-01 : f32
    %48 = vector.broadcast %cst_26 : f32 to vector<64x48xf32>
    %49 = arith.mulf %48, %47 : vector<64x48xf32>
    %c0_27 = arith.constant 0 : index
    %c0_28 = arith.constant 0 : index
    %50 = vector.load %arg11[%c0_27, %c0_28] : memref<64x48xf32, #tpu.memory_space<vmem>>, vector<64x48xf32>
    tpu.vector_store %arg11[%c0_27, %c0_28], %49 {strides = array<i32>} : memref<64x48xf32, #tpu.memory_space<vmem>>, vector<64x48xf32>,
    return
  }
  func.func @transform_0(%arg0: i32) -> (i32, i32) {
    %c0_i32 = arith.constant 0 : i32
    %c0_i32_0 = arith.constant 0 : i32
    return %arg0, %c0_i32 : i32, i32
  }
  func.func @transform_1(%arg0: i32) -> i32 {
    %c0_i32 = arith.constant 0 : i32
    %c0_i32_0 = arith.constant 0 : i32
    return %c0_i32 : i32
  }
  func.func @transform_2(%arg0: i32) -> (i32, i32) {
    %c0_i32 = arith.constant 0 : i32
    %c0_i32_0 = arith.constant 0 : i32
    %c0_i32_1 = arith.constant 0 : i32
    return %c0_i32, %c0_i32_0 : i32, i32
  }
  func.func @transform_3(%arg0: i32) -> (i32, i32) {
    %c0_i32 = arith.constant 0 : i32
    %c0_i32_0 = arith.constant 0 : i32
    %c0_i32_1 = arith.constant 0 : i32
    return %c0_i32, %c0_i32_0 : i32, i32
  }
  func.func @transform_4(%arg0: i32) -> (i32, i32) {
    %c0_i32 = arith.constant 0 : i32
    %c0_i32_0 = arith.constant 0 : i32
    %c0_i32_1 = arith.constant 0 : i32
    return %c0_i32, %c0_i32_0 : i32, i32
  }
  func.func @transform_5(%arg0: i32) -> (i32, i32) {
    %c0_i32 = arith.constant 0 : i32
    %c0_i32_0 = arith.constant 0 : i32
    %c0_i32_1 = arith.constant 0 : i32
    return %c0_i32, %c0_i32_0 : i32, i32
  }
  func.func @transform_6(%arg0: i32) -> (i32, i32) {
    %c0_i32 = arith.constant 0 : i32
    %c0_i32_0 = arith.constant 0 : i32
    %c0_i32_1 = arith.constant 0 : i32
    return %c0_i32, %c0_i32_0 : i32, i32
  }
  func.func @transform_7(%arg0: i32) -> (i32, i32) {
    %c0_i32 = arith.constant 0 : i32
    %c0_i32_0 = arith.constant 0 : i32
    %c0_i32_1 = arith.constant 0 : i32
    return %c0_i32, %c0_i32_0 : i32, i32
  }
  func.func @transform_8(%arg0: i32) -> (i32, i32) {
    %c0_i32 = arith.constant 0 : i32
    %c0_i32_0 = arith.constant 0 : i32
    %c0_i32_1 = arith.constant 0 : i32
    return %c0_i32, %c0_i32_0 : i32, i32
  }
  func.func @transform_9(%arg0: i32) -> (i32, i32) {
    %c0_i32 = arith.constant 0 : i32
    %c0_i32_0 = arith.constant 0 : i32
    %c0_i32_1 = arith.constant 0 : i32
    return %c0_i32, %c0_i32_0 : i32, i32
  }
  func.func @transform_10(%arg0: i32) -> (i32, i32) {
    %c0_i32 = arith.constant 0 : i32
    %c0_i32_0 = arith.constant 0 : i32
    return %arg0, %c0_i32 : i32, i32
  }
}

</mosaic_0001>

<bundles_post_ra>
// kernel: tpu_custom_call.1
= control target key start
LH: loop header
LB: loop body
LE: loop exit
PB: predicated region body
PF: predicated region fallthrough
CT: control target
= control target key end

     0   :  { %15 = vsyncpa [#allocation3], 0  ;;  %s2069_s13 = smov 0   ;;  %s2071_s14 = smov 0   ;;  %s2491_s0 = inlined_call_operand.vmem [shape: f32[200,181], index: 0, kind: input, shape index: {}]   ;;  %s2492_s1 = inlined_call_operand.vmem [shape: f32[3], index: 1, kind: input, shape index: {}]   ;;  %s2493_s2 = inlined_call_operand.vmem [shape: bf16[181,256], index: 2, kind: input, shape index: {}]   ;;  %s2494_s3 = inlined_call_operand.vmem [shape: f32[1,256], index: 3, kind: input, shape index: {}]   ;;  %s2495_s4 = inlined_call_operand.vmem [shape: bf16[256,128], index: 4, kind: input, shape index: {}]   ;;  %s2496_s5 = inlined_call_operand.vmem [shape: f32[1,128], index: 5, kind: input, shape index: {}]   ;;  %s2497_s6 = inlined_call_operand.vmem [shape: bf16[128,64], index: 6, kind: input, shape index: {}]   ;;  %s2498_s7 = inlined_call_operand.vmem [shape: f32[1,64], index: 7, kind: input, shape index: {}]   ;;  %s2499_s8 = inlined_call_operand.vmem [shape: bf16[64,48], index: 8, kind: input, shape index: {}]   ;;  %s2500_s9 = inlined_call_operand.vmem [shape: f32[1,48], index: 9, kind: input, shape index: {}]   ;;  %s2501_s10 = inlined_call_operand.vmem [shape: f32[200,48], index: 10, kind: output, shape index: {}]  }
   0x1   :  { %s2073_s15 = smov 0  }
   0x2 LB: > { %s2082_s16 = sadd.s32 4294967295, %s1978_s15   ;;  %s2084_s17 = sadd.s32 1, %s1978_s15   ;;  %s1978_s15 = sphi %s2073_s15, %s2509_s15   ;;  %s1974_s14 = sphi %s2071_s14, %s2508_s14   ;;  %s1970_s13 = sphi %s2069_s13, %s2507_s13  }
   0x3   : > { %s240_s18 = ssub.s32 %s1978_s15, %s2084_s17  ;;  %s243_s19 = sadd.s32 1, %s1974_s14 }
   0x4   : > { %p241_p0 = scmp.eq.s32.totalorder %s240_s18, 0  ;;  %p253_p1 = scmp.ne.s32.totalorder %s1974_s14, %s1970_s13 }
   0x5   : > { %p254_p2 = scmp.eq.s32.totalorder %s2082_s16, 3  ;;  %p1492_p3 = scmp.ge.s32.totalorder %s1978_s15, 1 }
   0x6   : > { %s2092_s20 = scalar_select %p241_p0, %s1974_s14, %s243_s19  }
   0x7   : > { %p2094_p4 = por %p254_p2, %p253_p1  ;;  %p267_p5 = scmp.lt.s32.totalorder %s1978_s15, 5 }
   0x8   : > { %p1794_p6 = scmp.eq.s32.totalorder %s2082_s16, 0  ;;  %s279_s24 = sshll.u32 %s2492_s1, 4  ;;  %s280_s24 = int_to_ptr.vmem [resolvable:$true] %s279_s24 }
   0x9   : > { %p268_p7 = pnand %p1492_p3, %p267_p5  ;;  %s2012_s25 = smov [#allocation2]  }
   0xb   : > { %p1790_p8 = pneg %p268_p7  ;;  %336 = sbr.rel (%p268_p7) target bundleno = 737 (0x2e1), region = 60 }
   0xd   : > { %p1791_p9 = pnand %p1794_p6, %p1790_p8 }
   0xf   : > { %1793 = dma.vmem_to_smem (!%p1791_p9), %s280_s24, 16, %s2012_s25, [#allocation3]  }
  0x10   : > { %1965 = dma.done.wait (%p1794_p6), [#allocation3], 16  }
  0x11   : > { %1967 = vsyncadd (%p1794_p6), [#allocation3], 4294967280 }
  0x12   : > { %343 = sfence }
  0x13   : > { %v1561_v0 = vld [vmem:[%s2493_s2 + $0x70] sm:$0xf]  ;;  %v1748_v1 = vld [vmem:[%s2493_s2 + $0x74] sm:$0xf0]  ;;  %v1747_v2 = vld [vmem:[%s2493_s2 + $0x74] sm:$0xf] }
  0x14   : > { %v1562_v3 = vor.u32 %v1748_v1, %v1561_v0  ;;  %v1563_v4 = vld [vmem:[%s2493_s2 + $0x78] sm:$0xf0]  ;;  %v1553_v5 = vld [vmem:[%s2493_s2 + $0x60] sm:$0xf]  ;;  %v1746_v6 = vld [vmem:[%s2493_s2 + $0x64] sm:$0xf0] }
  0x15   : > { %v1566_v7 = vor.u32 %v1747_v2, %v1563_v4  ;;  %v1745_v8 = vld [vmem:[%s2493_s2 + $0x64] sm:$0xf]  ;;  %v1555_v9 = vld [vmem:[%s2493_s2 + $0x68] sm:$0xf0]  ;;  %v1554_v10 = vor.u32 %v1746_v6, %v1553_v5  ;;  %v1545_v11 = vld [vmem:[%s2493_s2 + $0x50] sm:$0xf] }
  0x16   : > { %598 = vmatpush.bf16.msra.mxu0 %v1562_v3  ;;  %v1558_v12 = vor.u32 %v1745_v8, %v1555_v9  ;;  %v1744_v13 = vld [vmem:[%s2493_s2 + $0x54] sm:$0xf0]  ;;  %v453_v14 = vld [vmem:[%s2493_s2 + $0xb0] sm:$0x77]  ;;  %vm588_vm0 = vcmask 1041408   ;;  %vm589_vm1 = vcmask 1042432  }
  0x17   : > { %656 = vmatpush.bf16.msra.mxu2 %v1566_v7  ;;  %v1743_v15 = vld [vmem:[%s2493_s2 + $0x54] sm:$0xf]  ;;  %v1547_v16 = vld [vmem:[%s2493_s2 + $0x58] sm:$0xf0]  ;;  %v528_v17 = vunpack.c.h.b16 %v453_v14  ;;  %v527_v18 = vunpack.c.l.b16 %v453_v14  ;;  %v2013_v19 = vmov 65535   ;;  %s2142_s24 = sshll.u32 %s2082_s16, 3  ;;  %v1546_v21 = vor.u32 %v1744_v13, %v1545_v11 }
  0x18   : > { %v590_v20 = vsel %vm588_vm0, 4294967295, %v2013_v19  ;;  %v1537_v24 = vld [vmem:[%s2493_s2 + $0x40] sm:$0xf]  ;;  %v1550_v26 = vor.u32 %v1743_v15, %v1547_v16  ;;  %v1742_v27 = vld [vmem:[%s2493_s2 + $0x44] sm:$0xf0]  ;;  %p387_p10 = scmp.lt.s32.totalorder %s2142_s24, 24 }
  0x19   : > { %v552_v22 = vpack.c.b16 %v528_v17, %v528_v17  ;;  %v591_v23 = vsel %vm589_vm1, %v590_v20, 0  ;;  %v551_v25 = vpack.c.b16 %v527_v18, %v527_v18  ;;  %v1753_v28 = vld [vmem:[%s2493_s2 + $0xa4] sm:$0xf]  ;;  %v1587_v29 = vld [vmem:[%s2493_s2 + $0xa8] sm:$0xf0]  ;;  %v1538_v34 = vor.u32 %v1742_v27, %v1537_v24  ;;  %v1762_v27 = vld [vmem:[%s2495_s4 + $0x38] sm:$0xff] }
  0x1a   : > { %599 = vmatpush.bf16.msra.mxu0 %v1554_v10  ;;  %v1741_v31 = vld [vmem:[%s2493_s2 + $0x44] sm:$0xf]  ;;  %v1539_v32 = vld [vmem:[%s2493_s2 + $0x48] sm:$0xf0]  ;;  %v1590_v35 = vor.u32 %v1753_v28, %v1587_v29  ;;  %v1529_v36 = vld [vmem:[%s2493_s2 + $0x30] sm:$0xf] }
  0x1b   : > { %657 = vmatpush.bf16.msra.mxu2 %v1558_v12  ;;  %v596_v30 = vand.u32 %v591_v23, %v552_v22  ;;  %v593_v33 = vand.u32 %v591_v23, %v551_v25  ;;  %v1585_v37 = vld [vmem:[%s2493_s2 + $0xa0] sm:$0xf]  ;;  %v1754_v38 = vld [vmem:[%s2493_s2 + $0xa4] sm:$0xf0]  ;;  %v1542_v39 = vor.u32 %v1741_v31, %v1539_v32  ;;  %v1740_v40 = vld [vmem:[%s2493_s2 + $0x34] sm:$0xf0] }
  0x1c   : > { %v1751_v41 = vld [vmem:[%s2493_s2 + $0x94] sm:$0xf]  ;;  %v1579_v42 = vld [vmem:[%s2493_s2 + $0x98] sm:$0xf0]  ;;  %v1586_v43 = vor.u32 %v1754_v38, %v1585_v37  ;;  %s388_s27 = scalar_select %p387_p10, %s2142_s24, 24  ;;  %v1530_v48 = vor.u32 %v1740_v40, %v1529_v36  ;;  %vm575_vm2 = vcmask 433152  }
  0x1d   : > { %689 = vmatpush.bf16.msra.mxu3 %v596_v30  ;;  %631 = vmatpush.bf16.msra.mxu1 %v593_v33  ;;  %v1739_v44 = vld [vmem:[%s2493_s2 + $0x34] sm:$0xf]  ;;  %v1531_v45 = vld [vmem:[%s2493_s2 + $0x38] sm:$0xf0]  ;;  %v1577_v46 = vld [vmem:[%s2493_s2 + $0x90] sm:$0xf]  ;;  %v1582_v49 = vor.u32 %v1751_v41, %v1579_v42 }
  0x1e   : > { %600 = vmatpush.bf16.msra.mxu0 %v1546_v21  ;;  %v1752_v47 = vld [vmem:[%s2493_s2 + $0x94] sm:$0xf0]  ;;  %v1521_v50 = vld [vmem:[%s2493_s2 + $0x20] sm:$0xf]  ;;  %v1738_v51 = vld [vmem:[%s2493_s2 + $0x24] sm:$0xf0]  ;;  %v1534_v52 = vor.u32 %v1739_v44, %v1531_v45 }
  0x1f   : > { %658 = vmatpush.bf16.msra.mxu2 %v1550_v26  ;;  %s1732_s22 = sshll.u32 %s388_s27, 4  ;;  %v1737_v53 = vld [vmem:[%s2493_s2 + $0x24] sm:$0xf]  ;;  %v1571_v55 = vld [vmem:[%s2493_s2 + $0x88] sm:$0xf0]  ;;  %v1578_v56 = vor.u32 %v1752_v47, %v1577_v46  ;;  %v1522_v60 = vor.u32 %v1738_v51, %v1521_v50  ;;  %v1770_v26 = vld [vmem:[%s2495_s4 + $0x78] sm:$0xff] }
  0x20   : > { %v1749_v54 = vld [vmem:[%s2493_s2 + $0x84] sm:$0xf]  ;;  %s2214_s15 = scalar_lea.vmem %s2491_s0, %s1732_s22  ;;  %v1523_v57 = vld [vmem:[%s2493_s2 + $0x28] sm:$0xf0]  ;;  %v1569_v58 = vld [vmem:[%s2493_s2 + $0x80] sm:$0xf] }
  0x21   : > { %690 = vmatpush.bf16.msra.mxu3 %v1590_v35  ;;  %632 = vmatpush.bf16.msra.mxu1 %v1586_v43  ;;  %v1750_v59 = vld [vmem:[%s2493_s2 + $0x84] sm:$0xf0]  ;;  %v1574_v61 = vor.u32 %v1749_v54, %v1571_v55  ;;  %v1513_v62 = vld [vmem:[%s2493_s2 + $0x10] sm:$0xf]  ;;  %v410_v0 = vld [vmem:[%s2214_s15 + $0x18] sm:$0xff]  ;;  %v1526_v1 = vor.u32 %v1737_v53, %v1523_v57  ;;  %s404_s28 = sld [smem:[#allocation2]] }
  0x22   : > { %601 = vmatpush.bf16.msra.mxu0 %v1538_v34  ;;  %v408_v63 = vld [vmem:[%s2214_s15 + $0x8] sm:$0xff]  ;;  %v1736_v2 = vld [vmem:[%s2493_s2 + $0x14] sm:$0xf0]  ;;  %v1570_v3 = vor.u32 %v1750_v59, %v1569_v58  ;;  %v1735_v4 = vld [vmem:[%s2493_s2 + $0x14] sm:$0xf]  ;;  %s1501_s12 = sld [smem:[#allocation2 + $0x1]] }
  0x23   : > { %659 = vmatpush.bf16.msra.mxu2 %v1542_v39  ;;  %v1515_v5 = vld [vmem:[%s2493_s2 + $0x18] sm:$0xf0]  ;;  %v424_v6 = vpack.c.bf16 %v410_v0, %v408_v63  ;;  %v1514_v7 = vor.u32 %v1736_v2, %v1513_v62  ;;  %v1505_v9 = vld [vmem:[%s2493_s2] sm:$0xf]  ;;  %v1734_v10 = vld [vmem:[%s2493_s2 + $0x4] sm:$0xf0] }
  0x24   : > { %v1518_v8 = vor.u32 %v1735_v4, %v1515_v5  ;;  %v1733_v11 = vld [vmem:[%s2493_s2 + $0x4] sm:$0xf]  ;;  %v1507_v12 = vld [vmem:[%s2493_s2 + $0x8] sm:$0xf0]  ;;  %v1506_v13 = vor.u32 %v1734_v10, %v1505_v9  ;;  %v409_v15 = vld [vmem:[%s2214_s15 + $0x10] sm:$0xff]  ;;  %s1502_s30 = sld [smem:[#allocation2 + $0x2]] }
  0x25   : > { %691 = vmatpush.bf16.msra.mxu3 %v1582_v49  ;;  %633 = vmatpush.bf16.msra.mxu1 %v1578_v56  ;;  %v407_v14 = vld [vmem:[%s2214_s15] sm:$0xff]  ;;  %v1510_v16 = vor.u32 %v1733_v11, %v1507_v12  ;;  %v412_v18 = vld [vmem:[%s2214_s15 + $0x28] sm:$0xff]  ;;  %v414_v19 = vld [vmem:[%s2214_s15 + $0x38] sm:$0xff]  ;;  %s378_s18 = sand.u32 1, %s1970_s13   ;;  %s1243_s13 = ssub.s32 (%p2094_p4), 25, %s2142_s24 }
  0x26   : > { %602 = vmatpush.bf16.msra.mxu0 %v1530_v48  ;;  %v423_v17 = vpack.c.bf16 %v409_v15, %v407_v14  ;;  %v426_v20 = vpack.c.bf16 %v414_v19, %v412_v18  ;;  %v411_v21 = vld [vmem:[%s2214_s15 + $0x20] sm:$0xff]  ;;  %v413_v22 = vld [vmem:[%s2214_s15 + $0x30] sm:$0xff]  ;;  %v416_v24 = vld [vmem:[%s2214_s15 + $0x48] sm:$0xff]  ;;  %s1497_s19 = sshll.u32 %s378_s18, 6  ;;  %s1783_s25 = sshll.u32 (%p2094_p4), %s2082_s16, 6 }
  0x27   : > { %660 = vmatpush.bf16.msra.mxu2 %v1534_v52  ;;  %v425_v23 = vpack.c.bf16 %v413_v22, %v411_v21  ;;  %v418_v25 = vld [vmem:[%s2214_s15 + $0x58] sm:$0xff]  ;;  %v1769_v28 = vld [vmem:[%s2495_s4 + $0x70] sm:$0xff]  ;;  %v1768_v31 = vld [vmem:[%s2495_s4 + $0x68] sm:$0xff]  ;;  %v2329_v63 = vstv %s404_s28  ;;  %s2412_s23 = scalar_lea.vmem [#allocation4], %s1497_s19   ;;  %p1244_p11 = scmp.lt.s32.totalorder (%p2094_p4), %s1243_s13, 8 }
  0x28   : > { %v1761_v29 = vld [vmem:[%s2495_s4 + $0x30] sm:$0xff]  ;;  %v428_v30 = vpack.c.bf16 %v418_v25, %v416_v24  ;;  %v1760_v32 = vld [vmem:[%s2495_s4 + $0x28] sm:$0xff]  ;;  %v415_v33 = vld [vmem:[%s2214_s15 + $0x40] sm:$0xff]  ;;  %s2437_s28 = scalar_lea.vmem (%p2094_p4), %s2501_s10, %s1783_s25  }
  0x29   : > { %692 = vmatpush.bf16.msra.mxu3 %v1574_v61  ;;  %634 = vmatpush.bf16.msra.mxu1 %v1570_v3  ;;  %v417_v34 = vld [vmem:[%s2214_s15 + $0x50] sm:$0xff]  ;;  %v1767_v35 = vld [vmem:[%s2495_s4 + $0x60] sm:$0xff]  ;;  %v1766_v38 = vld [vmem:[%s2495_s4 + $0x58] sm:$0xff] }
  0x2a   : > { %603 = vmatpush.bf16.msra.mxu0 %v1522_v60  ;;  %v1759_v36 = vld [vmem:[%s2495_s4 + $0x20] sm:$0xff]  ;;  %v427_v37 = vpack.c.bf16 %v417_v34, %v415_v33  ;;  %v1758_v39 = vld [vmem:[%s2495_s4 + $0x18] sm:$0xff]  ;;  %v420_v40 = vld [vmem:[%s2214_s15 + $0x68] sm:$0xff] }
  0x2b   : > { %661 = vmatpush.bf16.msra.mxu2 %v1526_v1  ;;  %v422_v41 = vld [vmem:[%s2214_s15 + $0x78] sm:$0xff]  ;;  %v419_v43 = vld [vmem:[%s2214_s15 + $0x60] sm:$0xff]  ;;  %v421_v44 = vld [vmem:[%s2214_s15 + $0x70] sm:$0xff] }
  0x2c   : > { %1595 = vmatmul.msk.bf16.vlgmr.msra.gmra.mxu3 %vm575_vm2, %v424_v6  ;;  %1591 = vmatmul.msk.bf16.vlgmr.msra.gmra.mxu1 %vm575_vm2, %v424_v6  ;;  %v430_v42 = vpack.c.bf16 %v422_v41, %v420_v40  ;;  %v429_v45 = vpack.c.bf16 %v421_v44, %v419_v43  ;;  %v1765_v46 = vld [vmem:[%s2495_s4 + $0x50] sm:$0xff]  ;;  %v1756_v48 = vld [vmem:[%s2495_s4 + $0x8] sm:$0xff]  ;;  %v1755_v50 = vld [vmem:[%s2495_s4] sm:$0xff] }
  0x2d   : > { %932 = vmatpush.bf16.msrb.mxu3 %v1770_v26  ;;  %903 = vmatpush.bf16.msrb.mxu1 %v1762_v27  ;;  %v1757_v47 = vld [vmem:[%s2495_s4 + $0x10] sm:$0xff]  ;;  %v1764_v49 = vld [vmem:[%s2495_s4 + $0x48] sm:$0xff]  ;;  %v1763_v51 = vld [vmem:[%s2495_s4 + $0x40] sm:$0xff] }
  0x2e   : > { %604 = vmatpush.bf16.msra.mxu0 %v1514_v7  ;;  %v454_v53 = vld [vmem:[%s2494_s3] sm:$0x3] }
  0x2f   : > { %662 = vmatpush.bf16.msra.mxu2 %v1518_v8  ;;  %v2324_v54 = vperm.slane %v454_v53, 0  ;;  %v2327_v60 = vperm.slane %v454_v53, 1 }
  0x31   : > { %933 = vmatpush.bf16.msrb.mxu3 %v1769_v28  ;;  %904 = vmatpush.bf16.msrb.mxu1 %v1761_v29 }
  0x32   : > { %605 = vmatpush.bf16.msra.mxu0 %v1506_v13 }
  0x33   : > { %663 = vmatpush.bf16.msra.mxu2 %v1510_v16 }
  0x35   : > { %606 = vmatmul.bf16.vlgmr.msra.gmra.mxu0 %v423_v17  ;;  %934 = vmatpush.bf16.msrb.mxu3 %v1768_v31 }
  0x36   : > { %664 = vmatmul.bf16.vlgmr.msra.gmra.mxu2 %v423_v17  ;;  %905 = vmatpush.bf16.msrb.mxu1 %v1760_v32 }
  0x39   : > { %935 = vmatpush.bf16.msrb.mxu3 %v1767_v35 }
  0x3a   : > { %906 = vmatpush.bf16.msrb.mxu1 %v1759_v36 }
  0x3c   : > { %1596 = vmatmul.msk.bf16.gmra.mxu3 %vm575_vm2, %v426_v20  ;;  %1592 = vmatmul.msk.bf16.gmra.mxu1 %vm575_vm2, %v426_v20 }
  0x3d   : > { %936 = vmatpush.bf16.msrb.mxu3 %v1766_v38 }
  0x3e   : > { %907 = vmatpush.bf16.msrb.mxu1 %v1758_v39 }
  0x41   : > { %937 = vmatpush.bf16.msrb.mxu3 %v1765_v46 }
  0x42   : > { %908 = vmatpush.bf16.msrb.mxu1 %v1757_v47 }
  0x45   : > { %611 = vmatmul.bf16.gmra.mxu0 %v425_v23  ;;  %938 = vmatpush.bf16.msrb.mxu3 %v1764_v49 }
  0x46   : > { %669 = vmatmul.bf16.gmra.mxu2 %v425_v23  ;;  %909 = vmatpush.bf16.msrb.mxu1 %v1756_v48 }
  0x49   : > { %939 = vmatpush.bf16.msrb.mxu3 %v1763_v51 }
  0x4a   : > { %910 = vmatpush.bf16.msrb.mxu1 %v1755_v50 }
  0x4c   : > { %1597 = vmatmul.msk.bf16.gmra.mxu3 %vm575_vm2, %v428_v30  ;;  %1593 = vmatmul.msk.bf16.gmra.mxu1 %vm575_vm2, %v428_v30 }
  0x55   : > { %616 = vmatmul.bf16.gmra.mxu0 %v427_v37 }
  0x56   : > { %674 = vmatmul.bf16.gmra.mxu2 %v427_v37 }
  0x5c   : > { %1598 = vmatmul.msk.bf16.gmra.mxu3 %vm575_vm2, %v430_v42  ;;  %1594 = vmatmul.msk.bf16.gmra.mxu1 %vm575_vm2, %v430_v42 }
  0x65   : > { %621 = vmatmul.bf16.gmra.mxu0 %v429_v45 }
  0x66   : > { %679 = vmatmul.bf16.gmra.mxu2 %v429_v45 }
  0xa9   : > { %v636_v52 = vpop.f32.mrf.mxu1 }
  0xaf   : > { %v694_v55 = vpop.f32.mrf.mxu3 }
  0xb1   : > { %v638_v58 = vpop.f32.mrf.mxu1 }
  0xb2   : > { %v607_v56 = vpop.f32.mrf.mxu0 }
  0xb3   : > { %v608_v57 = vadd.f32 %v607_v56, %v2324_v54 }
  0xb5   : > { %v637_v59 = vadd.f32 %v636_v52, %v608_v57 }
  0xb7   : > { %v696_v61 = vpop.f32.mrf.mxu3  ;;  %v731_v1 = vmul.f32 %v2329_v63, %v637_v59  ;;  %vm714_vm3 = vcmp.gt.f32.partialorder %v637_v59, 0.0 }
  0xb9   : > { %v665_v62 = vpop.f32.mrf.mxu2  ;;  %v641_v3 = vpop.f32.mrf.mxu1  ;;  %v747_v7 = vsel %vm714_vm3, %v637_v59, %v731_v1 }
  0xba   : > { %v609_v0 = vpop.f32.mrf.mxu0  ;;  %v666_v4 = vadd.f32 %v665_v62, %v2327_v60 }
  0xbb   : > { %v610_v2 = vadd.f32 %v609_v0, %v2324_v54 }
  0xbc   : > { %v695_v8 = vadd.f32 %v694_v55, %v666_v4  ;;  %v1778_v55 = vld [vmem:[%s2497_s6 + $0x38] sm:$0xff]  ;;  %v1776_v4 = vld [vmem:[%s2497_s6 + $0x28] sm:$0xff] }
  0xbd   : > { %v639_v5 = vadd.f32 %v638_v58, %v610_v2  ;;  %1058 = vmatpush.bf16.msrb.mxu0 %v1778_v55  ;;  %v1777_v58 = vld [vmem:[%s2497_s6 + $0x30] sm:$0xff] }
  0xbe   : > { %v732_v17 = vmul.f32 %v2329_v63, %v695_v8  ;;  %vm715_vm5 = vcmp.gt.f32.partialorder %v695_v8, 0.0 }
  0xbf   : > { %vm716_vm4 = vcmp.gt.f32.partialorder %v639_v5, 0.0  ;;  %v733_v6 = vmul.f32 %v2329_v63, %v639_v5  ;;  %v699_v10 = vpop.f32.mrf.mxu3 }
  0xc0   : > { %v748_v21 = vsel %vm715_vm5, %v695_v8, %v732_v17 }
  0xc1   : > { %v667_v9 = vpop.f32.mrf.mxu2  ;;  %v749_v11 = vsel %vm716_vm4, %v639_v5, %v733_v6  ;;  %v643_v16 = vpop.f32.mrf.mxu1  ;;  %1059 = vmatpush.bf16.msrb.mxu0 %v1777_v58 }
  0xc2   : > { %v668_v12 = vadd.f32 %v667_v9, %v2327_v60  ;;  %v612_v13 = vpop.f32.mrf.mxu0  ;;  %v763_v14 = vpack.c.bf16 %v749_v11, %v747_v7  ;;  %v1775_v11 = vld [vmem:[%s2497_s6 + $0x20] sm:$0xff] }
  0xc3   : > { %v613_v15 = vadd.f32 %v612_v13, %v2324_v54 }
  0xc4   : > { %v697_v18 = vadd.f32 %v696_v61, %v668_v12  ;;  %911 = vmatmul.bf16.vlgmr.msrb.gmra.mxu1 %v763_v14 }
  0xc5   : > { %v642_v20 = vadd.f32 %v641_v3, %v613_v15  ;;  %1060 = vmatpush.bf16.msrb.mxu0 %v1776_v4 }
  0xc6   : > { %vm717_vm6 = vcmp.gt.f32.partialorder %v697_v18, 0.0  ;;  %v734_v19 = vmul.f32 %v2329_v63, %v697_v18 }
  0xc7   : > { %v735_v26 = vmul.f32 %v2329_v63, %v642_v20  ;;  %v701_v28 = vpop.f32.mrf.mxu3  ;;  %vm718_vm7 = vcmp.gt.f32.partialorder %v642_v20, 0.0 }
  0xc8   : > { %v750_v22 = vsel %vm717_vm6, %v697_v18, %v734_v19  ;;  %v1774_v19 = vld [vmem:[%s2497_s6 + $0x18] sm:$0xff] }
  0xc9   : > { %v670_v23 = vpop.f32.mrf.mxu2  ;;  %v764_v24 = vpack.c.bf16 %v750_v22, %v748_v21  ;;  %v646_v30 = vpop.f32.mrf.mxu1  ;;  %v751_v33 = vsel %vm718_vm7, %v642_v20, %v735_v26  ;;  %1061 = vmatpush.bf16.msrb.mxu0 %v1775_v11  ;;  %v1781_v11 = vld [vmem:[%s2499_s8 + $0x10] sm:$0xff] }
  0xca   : > { %v614_v25 = vpop.f32.mrf.mxu0  ;;  %v671_v29 = vadd.f32 %v670_v23, %v2327_v60 }
  0xcb   : > { %v615_v27 = vadd.f32 %v614_v25, %v2324_v54  ;;  %940 = vmatmul.bf16.vlgmr.msrb.gmra.mxu3 %v764_v24 }
  0xcc   : > { %v700_v34 = vadd.f32 %v699_v10, %v671_v29 }
  0xcd   : > { %v644_v31 = vadd.f32 %v643_v16, %v615_v27  ;;  %1062 = vmatpush.bf16.msrb.mxu0 %v1774_v19 }
  0xce   : > { %v736_v42 = vmul.f32 %v2329_v63, %v700_v34  ;;  %vm719_vm9 = vcmp.gt.f32.partialorder %v700_v34, 0.0 }
  0xcf   : > { %v737_v32 = vmul.f32 %v2329_v63, %v644_v31  ;;  %vm720_vm8 = vcmp.gt.f32.partialorder %v644_v31, 0.0  ;;  %v704_v43 = vpop.f32.mrf.mxu3 }
  0xd0   : > { %v752_v47 = vsel %vm719_vm9, %v700_v34, %v736_v42  ;;  %v1886_v42 = vld [vmem:[%s2496_s5] ss:$0 sm:$0xff] }
  0xd1   : > { %v672_v35 = vpop.f32.mrf.mxu2  ;;  %v753_v36 = vsel %vm720_vm8, %v644_v31, %v737_v32  ;;  %v648_v45 = vpop.f32.mrf.mxu1 }
  0xd2   : > { %v673_v37 = vadd.f32 %v672_v35, %v2327_v60  ;;  %v617_v38 = vpop.f32.mrf.mxu0  ;;  %v765_v39 = vpack.c.bf16 %v753_v36, %v751_v33 }
  0xd3   : > { %v618_v40 = vadd.f32 %v617_v38, %v2324_v54 }
  0xd4   : > { %v702_v41 = vadd.f32 %v701_v28, %v673_v37  ;;  %916 = vmatmul.bf16.gmra.mxu1 %v765_v39  ;;  %v1773_v39 = vld [vmem:[%s2497_s6 + $0x10] sm:$0xff] }
  0xd5   : > { %v647_v46 = vadd.f32 %v646_v30, %v618_v40  ;;  %1063 = vmatpush.bf16.msrb.mxu0 %v1773_v39  ;;  %v1771_v40 = vld [vmem:[%s2497_s6] sm:$0xff]  ;;  %v1095_v39 = vstv %s1502_s30 }
  0xd6   : > { %vm721_vm10 = vcmp.gt.f32.partialorder %v702_v41, 0.0  ;;  %v738_v44 = vmul.f32 %v2329_v63, %v702_v41 }
  0xd7   : > { %v739_v52 = vmul.f32 %v2329_v63, %v647_v46  ;;  %vm722_vm11 = vcmp.gt.f32.partialorder %v647_v46, 0.0  ;;  %v706_v59 = vpop.f32.mrf.mxu3 }
  0xd8   : > { %v754_v48 = vsel %vm721_vm10, %v702_v41, %v738_v44 }
  0xd9   : > { %v675_v49 = vpop.f32.mrf.mxu2  ;;  %v766_v50 = vpack.c.bf16 %v754_v48, %v752_v47  ;;  %v755_v62 = vsel %vm722_vm11, %v647_v46, %v739_v52  ;;  %v651_v1 = vpop.f32.mrf.mxu1  ;;  %v969_v47 = vstv %s1501_s12 }
  0xda   : > { %v619_v51 = vpop.f32.mrf.mxu0  ;;  %v676_v56 = vadd.f32 %v675_v49, %v2327_v60 }
  0xdb   : > { %v620_v53 = vadd.f32 %v619_v51, %v2324_v54  ;;  %945 = vmatmul.bf16.gmra.mxu3 %v766_v50 }
  0xdc   : > { %v705_v0 = vadd.f32 %v704_v43, %v676_v56 }
  0xdd   : > { %v649_v57 = vadd.f32 %v648_v45, %v620_v53 }
  0xde   : > { %v740_v10 = vmul.f32 %v2329_v63, %v705_v0  ;;  %vm723_vm13 = vcmp.gt.f32.partialorder %v705_v0, 0.0 }
  0xdf   : > { %v741_v61 = vmul.f32 %v2329_v63, %v649_v57  ;;  %vm724_vm12 = vcmp.gt.f32.partialorder %v649_v57, 0.0  ;;  %v709_v16 = vpop.f32.mrf.mxu3 }
  0xe0   : > { %v756_v14 = vsel %vm723_vm13, %v705_v0, %v740_v10  ;;  %v1782_v10 = vld [vmem:[%s2499_s8 + $0x18] sm:$0xff]  ;;  %vm1152_vm13 = vcmask 523264  }
  0xe1   : > { %v677_v2 = vpop.f32.mrf.mxu2  ;;  %v757_v3 = vsel %vm724_vm12, %v649_v57, %v741_v61  ;;  %v653_v21 = vpop.f32.mrf.mxu1  ;;  %1169 = vmatpush.bf16.msrb.mxu2 %v1782_v10 }
  0xe2   : > { %v678_v5 = vadd.f32 %v677_v2, %v2327_v60  ;;  %v622_v6 = vpop.f32.mrf.mxu0  ;;  %v767_v7 = vpack.c.bf16 %v757_v3, %v755_v62 }
  0xe3   : > { %v623_v8 = vadd.f32 %v622_v6, %v2324_v54 }
  0xe4   : > { %v707_v9 = vadd.f32 %v706_v59, %v678_v5  ;;  %921 = vmatmul.bf16.gmra.mxu1 %v767_v7 }
  0xe5   : > { %v652_v13 = vadd.f32 %v651_v1, %v623_v8  ;;  %1170 = vmatpush.bf16.msrb.mxu2 %v1781_v11  ;;  %v1888_v11 = vld [vmem:[%s2500_s9] ss:$0 sm:$0xff] }
  0xe6   : > { %vm725_vm14 = vcmp.gt.f32.partialorder %v707_v9, 0.0  ;;  %v742_v12 = vmul.f32 %v2329_v63, %v707_v9 }
  0xe7   : > { %v743_v22 = vmul.f32 %v2329_v63, %v652_v13  ;;  %vm726_vm15 = vcmp.gt.f32.partialorder %v652_v13, 0.0  ;;  %v711_v33 = vpop.f32.mrf.mxu3 }
  0xe8   : > { %v758_v15 = vsel %vm725_vm14, %v707_v9, %v742_v12 }
  0xe9   : > { %v680_v17 = vpop.f32.mrf.mxu2  ;;  %v768_v18 = vpack.c.bf16 %v758_v15, %v756_v14  ;;  %v759_v27 = vsel %vm726_vm15, %v652_v13, %v743_v22  ;;  %v1780_v14 = vld [vmem:[%s2499_s8 + $0x8] sm:$0xff] }
  0xea   : > { %v624_v20 = vpop.f32.mrf.mxu0  ;;  %v681_v24 = vadd.f32 %v680_v17, %v2327_v60  ;;  %1171 = vmatpush.bf16.msrb.mxu2 %v1780_v14 }
  0xeb   : > { %v625_v23 = vadd.f32 %v624_v20, %v2324_v54  ;;  %950 = vmatmul.bf16.gmra.mxu3 %v768_v18 }
  0xec   : > { %v710_v28 = vadd.f32 %v709_v16, %v681_v24 }
  0xed   : > { %v654_v25 = vadd.f32 %v653_v21, %v625_v23 }
  0xee   : > { %v744_v54 = vmul.f32 %v2329_v63, %v710_v28  ;;  %vm727_vm1 = vcmp.gt.f32.partialorder %v710_v28, 0.0 }
  0xef   : > { %v745_v26 = vmul.f32 %v2329_v63, %v654_v25  ;;  %vm728_vm0 = vcmp.gt.f32.partialorder %v654_v25, 0.0 }
  0xf0   : > { %v760_v36 = vsel %vm727_vm1, %v710_v28, %v744_v54 }
  0xf1   : > { %v682_v29 = vpop.f32.mrf.mxu2  ;;  %v761_v30 = vsel %vm728_vm0, %v654_v25, %v745_v26 }
  0xf2   : > { %v683_v31 = vadd.f32 %v682_v29, %v2327_v60  ;;  %v769_v32 = vpack.c.bf16 %v761_v30, %v759_v27  ;;  %v1772_v60 = vld [vmem:[%s2497_s6 + $0x8] sm:$0xff] }
  0xf3   : > { %1064 = vmatpush.bf16.msrb.mxu0 %v1772_v60 }
  0xf4   : > { %v712_v34 = vadd.f32 %v711_v33, %v683_v31  ;;  %926 = vmatmul.bf16.gmra.mxu1 %v769_v32 }
  0xf6   : > { %vm729_vm2 = vcmp.gt.f32.partialorder %v712_v34, 0.0  ;;  %v746_v35 = vmul.f32 %v2329_v63, %v712_v34 }
  0xf7   : > { %1065 = vmatpush.bf16.msrb.mxu0 %v1771_v40 }
  0xf8   : > { %v762_v37 = vsel %vm729_vm2, %v712_v34, %v746_v35  ;;  %v1779_v35 = vld [vmem:[%s2499_s8] sm:$0xff] }
  0xf9   : > { %v770_v38 = vpack.c.bf16 %v762_v37, %v760_v36  ;;  %1172 = vmatpush.bf16.msrb.mxu2 %v1779_v35  ;;  %v1887_v37 = vld [vmem:[%s2498_s7] ss:$0 sm:$0xff] }
  0xfb   : > { %955 = vmatmul.bf16.gmra.mxu3 %v770_v38 }
 0x141   : > { %v912_v63 = vpop.f32.mrf.mxu1 }
 0x142   : > { %v913_v44 = vadd.f32 %v1886_v42, %v912_v63 }
 0x149   : > { %v914_v41 = vpop.f32.mrf.mxu1 }
 0x14a   : > { %v915_v48 = vadd.f32 %v1886_v42, %v914_v41 }
 0x14e   : > { %v941_v43 = vpop.f32.mrf.mxu3 }
 0x14f   : > { %v942_v46 = vadd.f32 %v941_v43, %v913_v44 }
 0x151   : > { %v917_v45 = vpop.f32.mrf.mxu1  ;;  %v970_v50 = vmul.f32 %v969_v47, %v942_v46  ;;  %vm961_vm3 = vcmp.gt.f32.partialorder %v942_v46, 0.0 }
 0x152   : > { %v918_v59 = vadd.f32 %v1886_v42, %v917_v45 }
 0x153   : > { %v978_v55 = vsel %vm961_vm3, %v942_v46, %v970_v50 }
 0x156   : > { %v943_v49 = vpop.f32.mrf.mxu3 }
 0x157   : > { %v944_v51 = vadd.f32 %v943_v49, %v915_v48 }
 0x159   : > { %vm962_vm4 = vcmp.gt.f32.partialorder %v944_v51, 0.0  ;;  %v971_v52 = vmul.f32 %v969_v47, %v944_v51  ;;  %v919_v53 = vpop.f32.mrf.mxu1 }
 0x15a   : > { %v920_v0 = vadd.f32 %v1886_v42, %v919_v53 }
 0x15b   : > { %v979_v56 = vsel %vm962_vm4, %v944_v51, %v971_v52  ;;  %vm1226_vm4 = vcmask 392192  }
 0x15c   : > { %v986_v57 = vpack.c.bf16 %v979_v56, %v978_v55 }
 0x15e   : > { %v946_v58 = vpop.f32.mrf.mxu3  ;;  %1066 = vmatmul.bf16.vlgmr.msrb.gmra.mxu0 %v986_v57 }
 0x15f   : > { %v947_v61 = vadd.f32 %v946_v58, %v918_v59 }
 0x161   : > { %v922_v62 = vpop.f32.mrf.mxu1  ;;  %v972_v2 = vmul.f32 %v969_v47, %v947_v61  ;;  %vm963_vm5 = vcmp.gt.f32.partialorder %v947_v61, 0.0 }
 0x162   : > { %v923_v12 = vadd.f32 %v1886_v42, %v922_v62 }
 0x163   : > { %v980_v5 = vsel %vm963_vm5, %v947_v61, %v972_v2 }
 0x166   : > { %v948_v1 = vpop.f32.mrf.mxu3 }
 0x167   : > { %v949_v3 = vadd.f32 %v948_v1, %v920_v0 }
 0x169   : > { %v973_v4 = vmul.f32 %v969_v47, %v949_v3  ;;  %vm964_vm6 = vcmp.gt.f32.partialorder %v949_v3, 0.0  ;;  %v924_v8 = vpop.f32.mrf.mxu1 }
 0x16a   : > { %v925_v15 = vadd.f32 %v1886_v42, %v924_v8 }
 0x16b   : > { %v981_v6 = vsel %vm964_vm6, %v949_v3, %v973_v4 }
 0x16c   : > { %v987_v7 = vpack.c.bf16 %v981_v6, %v980_v5 }
 0x16e   : > { %v951_v9 = vpop.f32.mrf.mxu3  ;;  %1071 = vmatmul.bf16.gmra.mxu0 %v987_v7 }
 0x16f   : > { %v952_v13 = vadd.f32 %v951_v9, %v923_v12 }
 0x171   : > { %v974_v17 = vmul.f32 %v969_v47, %v952_v13  ;;  %v927_v19 = vpop.f32.mrf.mxu1  ;;  %vm965_vm7 = vcmp.gt.f32.partialorder %v952_v13, 0.0 }
 0x172   : > { %v928_v25 = vadd.f32 %v1886_v42, %v927_v19 }
 0x173   : > { %v982_v21 = vsel %vm965_vm7, %v952_v13, %v974_v17 }
 0x176   : > { %v953_v16 = vpop.f32.mrf.mxu3 }
 0x177   : > { %v954_v18 = vadd.f32 %v953_v16, %v925_v15 }
 0x179   : > { %v975_v20 = vmul.f32 %v969_v47, %v954_v18  ;;  %vm966_vm8 = vcmp.gt.f32.partialorder %v954_v18, 0.0  ;;  %v929_v26 = vpop.f32.mrf.mxu1 }
 0x17a   : > { %v930_v28 = vadd.f32 %v1886_v42, %v929_v26 }
 0x17b   : > { %v983_v22 = vsel %vm966_vm8, %v954_v18, %v975_v20 }
 0x17c   : > { %v988_v23 = vpack.c.bf16 %v983_v22, %v982_v21 }
 0x17e   : > { %v956_v24 = vpop.f32.mrf.mxu3  ;;  %1076 = vmatmul.bf16.gmra.mxu0 %v988_v23 }
 0x17f   : > { %v957_v27 = vadd.f32 %v956_v24, %v928_v25 }
 0x181   : > { %v976_v30 = vmul.f32 %v969_v47, %v957_v27  ;;  %vm967_vm9 = vcmp.gt.f32.partialorder %v957_v27, 0.0 }
 0x183   : > { %v984_v33 = vsel %vm967_vm9, %v957_v27, %v976_v30 }
 0x186   : > { %v958_v29 = vpop.f32.mrf.mxu3 }
 0x187   : > { %v959_v31 = vadd.f32 %v958_v29, %v930_v28 }
 0x189   : > { %v977_v32 = vmul.f32 %v969_v47, %v959_v31  ;;  %vm968_vm10 = vcmp.gt.f32.partialorder %v959_v31, 0.0 }
 0x18b   : > { %v985_v34 = vsel %vm968_vm10, %v959_v31, %v977_v32 }
 0x18c   : > { %v989_v54 = vpack.c.bf16 %v985_v34, %v984_v33 }
 0x18e   : > { %1081 = vmatmul.bf16.gmra.mxu0 %v989_v54 }
 0x1db   : > { %v1067_v36 = vpop.f32.mrf.mxu0 }
 0x1dc   : > { %v1068_v38 = vadd.f32 %v1887_v37, %v1067_v36 }
 0x1de   : > { %v1096_v40 = vmul.f32 %v1095_v39, %v1068_v38  ;;  %vm1087_vm11 = vcmp.gt.f32.partialorder %v1068_v38, 0.0 }
 0x1e0   : > { %v1104_v42 = vsel %vm1087_vm11, %v1068_v38, %v1096_v40 }
 0x1e3   : > { %v1069_v60 = vpop.f32.mrf.mxu0 }
 0x1e4   : > { %v1070_v63 = vadd.f32 %v1887_v37, %v1069_v60 }
 0x1e6   : > { %vm1088_vm12 = vcmp.gt.f32.partialorder %v1070_v63, 0.0  ;;  %v1097_v41 = vmul.f32 %v1095_v39, %v1070_v63 }
 0x1e8   : > { %v1105_v43 = vsel %vm1088_vm12, %v1070_v63, %v1097_v41 }
 0x1e9   : > { %v1112_v44 = vpack.c.bf16 %v1105_v43, %v1104_v42 }
 0x1eb   : > { %v1072_v45 = vpop.f32.mrf.mxu0  ;;  %1711 = vmatmul.msk.bf16.vlgmr.msrb.gmra.mxu2 %vm1152_vm13, %v1112_v44 }
 0x1ec   : > { %v1073_v46 = vadd.f32 %v1887_v37, %v1072_v45 }
 0x1ee   : > { %v1098_v48 = vmul.f32 %v1095_v39, %v1073_v46  ;;  %vm1089_vm14 = vcmp.gt.f32.partialorder %v1073_v46, 0.0 }
 0x1f0   : > { %v1106_v51 = vsel %vm1089_vm14, %v1073_v46, %v1098_v48 }
 0x1f3   : > { %v1074_v47 = vpop.f32.mrf.mxu0 }
 0x1f4   : > { %v1075_v49 = vadd.f32 %v1887_v37, %v1074_v47 }
 0x1f6   : > { %vm1090_vm15 = vcmp.gt.f32.partialorder %v1075_v49, 0.0  ;;  %v1099_v50 = vmul.f32 %v1095_v39, %v1075_v49 }
 0x1f8   : > { %v1107_v52 = vsel %vm1090_vm15, %v1075_v49, %v1099_v50 }
 0x1f9   : > { %v1113_v53 = vpack.c.bf16 %v1107_v52, %v1106_v51 }
 0x1fb   : > { %v1077_v55 = vpop.f32.mrf.mxu0  ;;  %1712 = vmatmul.msk.bf16.gmra.mxu2 %vm1152_vm13, %v1113_v53 }
 0x1fc   : > { %v1078_v56 = vadd.f32 %v1887_v37, %v1077_v55 }
 0x1fe   : > { %v1100_v58 = vmul.f32 %v1095_v39, %v1078_v56  ;;  %vm1091_vm0 = vcmp.gt.f32.partialorder %v1078_v56, 0.0 }
 0x200   : > { %v1108_v62 = vsel %vm1091_vm0, %v1078_v56, %v1100_v58 }
 0x203   : > { %v1079_v57 = vpop.f32.mrf.mxu0 }
 0x204   : > { %v1080_v59 = vadd.f32 %v1887_v37, %v1079_v57 }
 0x206   : > { %vm1092_vm1 = vcmp.gt.f32.partialorder %v1080_v59, 0.0  ;;  %v1101_v61 = vmul.f32 %v1095_v39, %v1080_v59 }
 0x208   : > { %v1109_v0 = vsel %vm1092_vm1, %v1080_v59, %v1101_v61 }
 0x209   : > { %v1114_v1 = vpack.c.bf16 %v1109_v0, %v1108_v62 }
 0x20b   : > { %v1082_v2 = vpop.f32.mrf.mxu0  ;;  %1713 = vmatmul.msk.bf16.gmra.mxu2 %vm1152_vm13, %v1114_v1 }
 0x20c   : > { %v1083_v3 = vadd.f32 %v1887_v37, %v1082_v2 }
 0x20e   : > { %v1102_v5 = vmul.f32 %v1095_v39, %v1083_v3  ;;  %vm1093_vm2 = vcmp.gt.f32.partialorder %v1083_v3, 0.0 }
 0x210   : > { %v1110_v8 = vsel %vm1093_vm2, %v1083_v3, %v1102_v5 }
 0x213   : > { %v1084_v4 = vpop.f32.mrf.mxu0 }
 0x214   : > { %v1085_v6 = vadd.f32 %v1887_v37, %v1084_v4 }
 0x216   : > { %vm1094_vm3 = vcmp.gt.f32.partialorder %v1085_v6, 0.0  ;;  %v1103_v7 = vmul.f32 %v1095_v39, %v1085_v6 }
 0x218   : > { %v1111_v9 = vsel %vm1094_vm3, %v1085_v6, %v1103_v7 }
 0x219   : > { %v1115_v10 = vpack.c.bf16 %v1111_v9, %v1110_v8 }
 0x21b   : > { %1714 = vmatmul.msk.bf16.gmra.mxu2 %vm1152_vm13, %v1115_v10 }
 0x26e   : > { %v1174_v12 = vpop.f32.mrf.mxu2 }
 0x26f   : > { %v1175_v13 = vadd.f32 %v1888_v11, %v1174_v12 }
 0x271   : > { %v1194_v14 = vmul.f32 0.5, %v1175_v13 }
 0x273   : > { %1889 = vtanh.f32 %v1194_v14 }
 0x276   : > { %v1176_v15 = vpop.f32.mrf.mxu2 }
 0x277   : > { %v1177_v16 = vadd.f32 %v1888_v11, %v1176_v15 }
 0x279   : > { %v1890_v17 = vpop.eup %1889  ;;  %v1195_v18 = vmul.f32 0.5, %v1177_v16 }
 0x27a   : > { %v1210_v19 = vadd.f32 1.0, %v1890_v17 }
 0x27b   : > { %1891 = vtanh.f32 %v1195_v18 }
 0x27c   : > { %v1218_v20 = vmul.f32 0.5, %v1210_v19 }
 0x27e   : > { %1227 = vst.msk [vmem:[%s2412_s23] sm:$0xff] %vm1226_vm4, %v1218_v20  ;;  %v1179_v21 = vpop.f32.mrf.mxu2 }
 0x27f   : > { %v1180_v22 = vadd.f32 %v1888_v11, %v1179_v21 }
 0x281   : > { %v1892_v23 = vpop.eup %1891  ;;  %v1196_v24 = vmul.f32 0.5, %v1180_v22 }
 0x282   : > { %v1211_v25 = vadd.f32 1.0, %v1892_v23 }
 0x283   : > { %1893 = vtanh.f32 %v1196_v24 }
 0x284   : > { %v1219_v26 = vmul.f32 0.5, %v1211_v25 }
 0x286   : > { %1228 = vst.msk [vmem:[%s2412_s23 + $0x8] sm:$0xff] %vm1226_vm4, %v1219_v26  ;;  %v1181_v27 = vpop.f32.mrf.mxu2 }
 0x287   : > { %v1182_v28 = vadd.f32 %v1888_v11, %v1181_v27 }
 0x289   : > { %v1894_v29 = vpop.eup %1893  ;;  %v1197_v30 = vmul.f32 0.5, %v1182_v28 }
 0x28a   : > { %v1212_v31 = vadd.f32 1.0, %v1894_v29 }
 0x28b   : > { %1895 = vtanh.f32 %v1197_v30 }
 0x28c   : > { %v1220_v32 = vmul.f32 0.5, %v1212_v31 }
 0x28e   : > { %1229 = vst.msk [vmem:[%s2412_s23 + $0x10] sm:$0xff] %vm1226_vm4, %v1220_v32  ;;  %v1184_v33 = vpop.f32.mrf.mxu2 }
 0x28f   : > { %v1185_v34 = vadd.f32 %v1888_v11, %v1184_v33 }
 0x291   : > { %v1896_v54 = vpop.eup %1895  ;;  %v1198_v35 = vmul.f32 0.5, %v1185_v34 }
 0x292   : > { %v1213_v36 = vadd.f32 1.0, %v1896_v54 }
 0x293   : > { %1897 = vtanh.f32 %v1198_v35 }
 0x294   : > { %v1221_v37 = vmul.f32 0.5, %v1213_v36 }
 0x296   : > { %1230 = vst.msk [vmem:[%s2412_s23 + $0x18] sm:$0xff] %vm1226_vm4, %v1221_v37  ;;  %v1186_v38 = vpop.f32.mrf.mxu2 }
 0x297   : > { %v1187_v39 = vadd.f32 %v1888_v11, %v1186_v38 }
 0x299   : > { %v1898_v60 = vpop.eup %1897  ;;  %v1199_v40 = vmul.f32 0.5, %v1187_v39 }
 0x29a   : > { %v1214_v63 = vadd.f32 1.0, %v1898_v60 }
 0x29b   : > { %1899 = vtanh.f32 %v1199_v40 }
 0x29c   : > { %v1222_v41 = vmul.f32 0.5, %v1214_v63 }
 0x29e   : > { %1231 = vst.msk [vmem:[%s2412_s23 + $0x20] sm:$0xff] %vm1226_vm4, %v1222_v41  ;;  %v1189_v42 = vpop.f32.mrf.mxu2 }
 0x29f   : > { %v1190_v43 = vadd.f32 %v1888_v11, %v1189_v42 }
 0x2a1   : > { %v1900_v44 = vpop.eup %1899  ;;  %v1200_v45 = vmul.f32 0.5, %v1190_v43 }
 0x2a2   : > { %v1215_v46 = vadd.f32 1.0, %v1900_v44 }
 0x2a3   : > { %1901 = vtanh.f32 %v1200_v45 }
 0x2a4   : > { %v1223_v47 = vmul.f32 0.5, %v1215_v46 }
 0x2a6   : > { %1232 = vst.msk [vmem:[%s2412_s23 + $0x28] sm:$0xff] %vm1226_vm4, %v1223_v47  ;;  %v1191_v48 = vpop.f32.mrf.mxu2 }
 0x2a7   : > { %v1192_v49 = vadd.f32 %v1888_v11, %v1191_v48 }
 0x2a9   : > { %v1902_v50 = vpop.eup %1901  ;;  %v1201_v51 = vmul.f32 0.5, %v1192_v49 }
 0x2aa   : > { %v1216_v52 = vadd.f32 1.0, %v1902_v50 }
 0x2ab   : > { %1903 = vtanh.f32 %v1201_v51 }
 0x2ac   : > { %v1224_v53 = vmul.f32 0.5, %v1216_v52 }
 0x2ae   : > { %1233 = vst.msk [vmem:[%s2412_s23 + $0x30] sm:$0xff] %vm1226_vm4, %v1224_v53 }
 0x2b1   : > { %v1904_v55 = vpop.eup %1903 }
 0x2b2   : > { %v1217_v56 = vadd.f32 1.0, %v1904_v55  ;;  %1241 = sbr.rel (!%p2094_p4) target bundleno = 737 (0x2e1), region = 68 }
 0x2b4   : > { %v1225_v57 = vmul.f32 0.5, %v1217_v56 }
 0x2b6   : > { %1234 = vst.msk [vmem:[%s2412_s23 + $0x38] sm:$0xff] %vm1226_vm4, %v1225_v57 }
 0x2b7   : > { %s2511_s13 = smov (!%p1244_p11, %s1243_s13), 8 }
 0x2b8   : > { %s1717_s29 = sshll.u32 %s2511_s13, 3 }
 0x2b9   : > { %p1720_p12 = scmp.eq.s32.totalorder %s1717_s29, 0 }
 0x2ba   : > { %s2443_s30 = sshrl.u32 (!%p1720_p12), %s2511_s13, 3 }
 0x2bb   : > { %1252 = sbr.rel (%p1720_p12) target bundleno = 737 (0x2e1), region = 72  ;;  %p1721_p13 = scmp.le.s32.totalorder (!%p1720_p12), %s2443_s30, 0 }
 0x2c0   : > { %1438 = sbr.rel (%p1721_p13) target bundleno = 720 (0x2d0), region = 149  ;;  %s2503_s16 = smov (!%p1721_p13), %s2437_s28 }
 0x2c1   : > { %s2504_s21 = smov (!%p1721_p13), %s2412_s23  ;;  %s2452_s24 = smov (!%p1721_p13), 0  }
 0x2c2   : > { %s2454_s11 = smov (!%p1721_p13), 0  }
 0x2c5 LB: >> { %v1329_v58 = vld [vmem:[%s1986_s21] sm:$0xff]  ;;  %v1331_v59 = vld [vmem:[%s1986_s21 + $0x8] sm:$0xff]  ;;  %v1333_v61 = vld [vmem:[%s1986_s21 + $0x10] sm:$0xff]  ;;  %s1345_s12 = sadd.s32 1, %s1990_s24  ;;  %s1323_s11 = sadd.s32 1, %s1994_s11   ;;  %s1994_s11 = sphi %s2454_s11, %s1323_s11   ;;  %s1990_s24 = sphi %s2452_s24, %s2506_s24   ;;  %s1986_s21 = sphi %s2504_s21, %s1350_s21   ;;  %s1982_s16 = sphi %s2503_s16, %s2505_s16  }
 0x2c6   : >> { %1330 = vst [vmem:[%s1982_s16] sm:$0xff] %v1329_v58  ;;  %v1335_v62 = vld [vmem:[%s1986_s21 + $0x18] sm:$0xff]  ;;  %p1346_p0 = scmp.ge.s32.totalorder %s1345_s12, %s2443_s30  ;;  %v1337_v0 = vld [vmem:[%s1986_s21 + $0x20] sm:$0xff]  ;;  %v1339_v1 = vld [vmem:[%s1986_s21 + $0x28] sm:$0xff]  ;;  %p1322_p1 = scmp.ge.s32.totalorder %s1323_s11, %s2443_s30 }
 0x2c7   : >> { %1332 = vst [vmem:[%s1982_s16 + $0x8] sm:$0xff] %v1331_v59  ;;  %v1341_v2 = vld [vmem:[%s1986_s21 + $0x30] sm:$0xff]  ;;  %v1343_v3 = vld [vmem:[%s1986_s21 + $0x38] sm:$0xff] }
 0x2c8   : >> { %1334 = vst [vmem:[%s1982_s16 + $0x10] sm:$0xff] %v1333_v61  ;;  %s2513_s12 = smov (%p1346_p0, %s1345_s12), 0 }
 0x2c9   : >> { %1336 = vst [vmem:[%s1982_s16 + $0x18] sm:$0xff] %v1335_v62  ;;  %s1722_s15 = sshll.u32 %s2513_s12, 6  ;;  %s2506_s24 = smov %s2513_s12 }
 0x2ca   : >> { %1338 = vst [vmem:[%s1982_s16 + $0x20] sm:$0xff] %v1337_v0  ;;  %s1350_s21 = scalar_lea.vmem %s2412_s23, %s1722_s15 [#allocation4]   ;;  %s1351_s27 = scalar_lea.vmem %s2437_s28, %s1722_s15  }
 0x2cb   : >> { %1340 = vst [vmem:[%s1982_s16 + $0x28] sm:$0xff] %v1339_v1  ;;  %1325 = sbr.rel (!%p1322_p1) target bundleno = 709 (0x2c5), region = 155 }
 0x2cc   : >> { %1342 = vst [vmem:[%s1982_s16 + $0x30] sm:$0xff] %v1341_v2 }
 0x2cd   : >> { %1344 = vst [vmem:[%s1982_s16 + $0x38] sm:$0xff] %v1343_v3  ;;  %s2505_s16 = smov %s1351_s27 }
 0x2d0 PF: > { %s2473_s18 = sand.u32 7, %s2511_s13   ;;  %s1784_s19 = sshll.u32 %s2443_s30, 6 }
 0x2d1   : > { %s1356_s25 = scalar_lea.vmem %s2412_s23, %s1784_s19 [#allocation4]   ;;  %s1358_s26 = scalar_lea.vmem %s2437_s28, %s1784_s19  }
 0x2d2   : > { %p1727_p2 = scmp.le.s32.totalorder %s2473_s18, 0 }
 0x2d3   : > { %s1996_s22 = smov (!%p1727_p2), %s1358_s26   ;;  %s2000_s29 = smov (!%p1727_p2), %s1356_s25  }
 0x2d4   : > { %1452 = sbr.rel (%p1727_p2) target bundleno = 737 (0x2e1), region = 160  ;;  %s2004_s15 = smov (!%p1727_p2), 0  }
 0x2d5   : > { %s2008_s12 = smov (!%p1727_p2), 0  }
 0x2d9 LB: >> { %v1368_v4 = vld [vmem:[%s2002_s29] sm:$0xff]  ;;  %s1370_s13 = sadd.s32 1, %s2006_s15  ;;  %s1362_s12 = sadd.s32 1, %s2010_s12   ;;  %s2010_s12 = sphi %s2008_s12, %s1362_s12   ;;  %s2006_s15 = sphi %s2004_s15, %s2005_s15   ;;  %s2002_s29 = sphi %s2000_s29, %s1375_s29   ;;  %s1998_s22 = sphi %s1996_s22, %s1376_s22  }
 0x2da   : >> { %1369 = vst [vmem:[%s1998_s22] sm:$0xff] %v1368_v4  ;;  %p1371_p3 = scmp.ge.s32.totalorder %s1370_s13, %s2473_s18  ;;  %p1361_p4 = scmp.ge.s32.totalorder %s1362_s12, %s2473_s18 }
 0x2dc   : >> { %s2515_s13 = smov (%p1371_p3, %s1370_s13), 0  ;;  %1364 = sbr.rel (!%p1361_p4) target bundleno = 729 (0x2d9), region = 166 }
 0x2dd   : >> { %s1728_s23 = sshll.u32 %s2515_s13, 3  ;;  %s2005_s15 = smov %s2515_s13  }
 0x2de   : >> { %s1375_s29 = scalar_lea.vmem %s1356_s25, %s1728_s23 [#allocation4]   ;;  %s1376_s22 = scalar_lea.vmem %s1358_s26, %s1728_s23  }
 0x2e1 PF: > { %p18_p5 = scmp.ge.s32.totalorder %s2084_s17, 6   ;;  %s2507_s13 = smov %s1974_s14 }
 0x2e2   : > { %s2508_s14 = smov %s2092_s20  ;;  %s2509_s15 = smov %s2084_s17 }
 0x2e3   :  { %20 = sbr.rel (!%p18_p5) target bundleno = 2 (0x2), region = 177 }
 0x2e8   :  { %1392 = vsyncpa [#allocation3], 1 }
 0x2e9   :  { %1394 = vsyncpa [#allocation3 + $0x1], 1 }

</bundles_post_ra>
